<compile_context>
chip_gen: v7x
topology: tpu7x:2x2x1
jax: 0.10.0
libtpu: 0.0.40
codegen_flags: <defaults>
</compile_context>

<pallas_src>
import functools

import jax
import jax.numpy as jnp
from jax.experimental import pallas as pl
from jax.experimental.pallas import tpu as pltpu


def _round_up(x, m):
    return ((x + m - 1) // m) * m


def _disc_mlp_kernel(*refs, has_ac):
    """Fused 3-layer MLP over one batch tile.

    concat([ob, ac]) @ W1 is computed as ob@W1a + ac@W1b (concat fused away).
    Final layer produces a lane-dense (1, batch_tile) block.
    """
    if has_ac:
        (ob_ref, ac_ref, w1a_ref, w1b_ref, b1_ref, w2_ref, b2_ref,
         w3t_ref, b3_ref, o_ref) = refs
    else:
        (ob_ref, w1a_ref, b1_ref, w2_ref, b2_ref,
         w3t_ref, b3_ref, o_ref) = refs

    # Layer 1: (bt, ob_dim) @ (ob_dim, H) [+ (bt, ac_dim) @ (ac_dim, H)] + b1
    h = jnp.dot(ob_ref[...], w1a_ref[...], preferred_element_type=jnp.float32)
    if has_ac:
        h = h + jnp.dot(ac_ref[...], w1b_ref[...],
                        preferred_element_type=jnp.float32)
    h = jnp.maximum(h + b1_ref[...], 0.0)          # relu

    # Layer 2: (bt, H) @ (H, H) + b2
    h = jnp.dot(h, w2_ref[...], preferred_element_type=jnp.float32)
    h = jnp.maximum(h + b2_ref[...], 0.0)

    # Layer 3 (out_dim = 1), lane-dense: contract (1, H) with (bt, H) -> (1, bt)
    out_t = jax.lax.dot_general(
        w3t_ref[...], h,
        dimension_numbers=(((1,), (1,)), ((), ())),
        preferred_element_type=jnp.float32)
    o_ref[...] = (out_t + b3_ref[0, 0]).astype(o_ref.dtype)


def discriminator_forward(ob, ac, params, *, batch_tile=512):
    """ob: [B, ob_dim], ac: [B, ac_dim] (or None). Returns [B, 1] logits."""
    B, ob_dim = ob.shape
    has_ac = ac is not None
    ac_dim = ac.shape[1] if has_ac else 0

    w1, b1 = params["w1"], params["b1"]
    w2, b2 = params["w2"], params["b2"]
    w3, b3 = params["w3"], params["b3"]
    H = w1.shape[1]
    assert w1.shape[0] == ob_dim + ac_dim, "w1 must match ob(+ac) feature dim"

    # One-time (tiny) weight re-layout outside the grid:
    w1a = w1[:ob_dim]                       # (ob_dim, H)
    w1b = w1[ob_dim:] if has_ac else None   # (ac_dim, H)
    w3t = w3.T                              # (1, H) row for lane-dense output
    b1 = b1.reshape(1, H)
    b2 = b2.reshape(1, H)
    b3 = b3.reshape(1, 1)

    # Batch tiling: big tiles amortize per-step overhead; tile is a multiple of
    # 128 so output stores are unmasked/lane-dense. Pad batch to the tile.
    bt = _round_up(min(batch_tile, _round_up(B, 128)), 128)
    B_pad = _round_up(B, bt)
    if B_pad != B:
        ob = jnp.pad(ob, ((0, B_pad - B), (0, 0)))
        if has_ac:
            ac = jnp.pad(ac, ((0, B_pad - B), (0, 0)))
    grid = (B_pad // bt,)

    full = lambda i: (0, 0)  # weights/biases: same (resident) block every step

    in_specs = [pl.BlockSpec((bt, ob_dim), lambda i: (i, 0))]
    inputs = [ob]
    if has_ac:
        in_specs.append(pl.BlockSpec((bt, ac_dim), lambda i: (i, 0)))
        inputs.append(ac)
    in_specs.append(pl.BlockSpec((ob_dim, H), full))
    inputs.append(w1a)
    if has_ac:
        in_specs.append(pl.BlockSpec((ac_dim, H), full))
        inputs.append(w1b)
    in_specs += [
        pl.BlockSpec((1, H), full),                          # b1
        pl.BlockSpec((H, H), full),                          # w2
        pl.BlockSpec((1, H), full),                          # b2
        pl.BlockSpec((1, H), full),                          # w3^T
        pl.BlockSpec(memory_space=pltpu.MemorySpace.SMEM),   # b3 scalar
    ]
    inputs += [b1, w2, b2, w3t, b3]

    out = pl.pallas_call(
        functools.partial(_disc_mlp_kernel, has_ac=has_ac),
        out_shape=jax.ShapeDtypeStruct((1, B_pad), jnp.float32),
        grid_spec=pltpu.PrefetchScalarGridSpec(
            num_scalar_prefetch=0,
            grid=grid,
            in_specs=in_specs,
            out_specs=pl.BlockSpec((1, bt), lambda i: (0, i)),
        ),
        compiler_params=pltpu.CompilerParams(
            dimension_semantics=("parallel",)),
    )(*inputs)

    return out[0, :B, None]                 # (B, 1)


def init_params(key, input_dim, hidden_dim, out_dim=1):
    """Deterministic synthetic weights (shapes match MLP(input_dim,1,[H,H]))."""
    k1, k2, k3 = jax.random.split(key, 3)
    s1 = 1.0 / jnp.sqrt(jnp.float32(input_dim))
    s2 = 1.0 / jnp.sqrt(jnp.float32(hidden_dim))
    return {
        "w1": jax.random.uniform(k1, (input_dim, hidden_dim), jnp.float32,
                                 -s1, s1),
        "b1": jnp.zeros((1, hidden_dim), jnp.float32),
        "w2": jax.random.uniform(k2, (hidden_dim, hidden_dim), jnp.float32,
                                 -s2, s2),
        "b2": jnp.zeros((1, hidden_dim), jnp.float32),
        "w3": jax.random.uniform(k3, (hidden_dim, out_dim), jnp.float32,
                                 -s2, s2),
        "b3": jnp.zeros((1, out_dim), jnp.float32),
    }


def _reference_forward(ob, ac, params):
    """Pure-JAX reference of the same MLP for a correctness check."""
    x = jnp.concatenate([ob, ac], axis=-1) if ac is not None else ob
    h = jnp.maximum(x @ params["w1"] + params["b1"], 0.0)
    h = jnp.maximum(h @ params["w2"] + params["b2"], 0.0)
    return h @ params["w3"] + params["b3"]


if __name__ == "__main__":
    # Small deterministic example: flattened ob dim=12, ac dim=4, hidden=32,
    # batch=16 (padded internally to one 128-row lane-dense tile).
    B, OB_DIM, AC_DIM, HIDDEN = 16, 12, 4, 32
    key = jax.random.PRNGKey(0)
    k_ob, k_ac, k_p1, k_p2 = jax.random.split(key, 4)

    ob = jax.random.normal(k_ob, (B, OB_DIM), jnp.float32)
    ac = jax.random.normal(k_ac, (B, AC_DIM), jnp.float32)

    # With action (ob + ac concat fused into the first matmul).
    params = init_params(k_p1, OB_DIM + AC_DIM, HIDDEN)
    out = jax.block_until_ready(discriminator_forward(ob, ac, params))
    ref = _reference_forward(ob, ac, params)
    assert out.shape == (B, 1)
    assert jnp.allclose(out, ref, atol=1e-5, rtol=1e-5)

    # No-action path (ac_space is None in the original module).
    params_no_ac = init_params(k_p2, OB_DIM, HIDDEN)
    out2 = jax.block_until_ready(discriminator_forward(ob, None, params_no_ac))
    ref2 = _reference_forward(ob, None, params_no_ac)
    assert out2.shape == (B, 1)
    assert jnp.allclose(out2, ref2, atol=1e-5, rtol=1e-5)

    print("KERNEL_OK")
</pallas_src>

<mosaic_0001>
module attributes {stable_mosaic.version = 11 : i64} {
  func.func @_disc_mlp_kernel(%arg0: i32, %arg1: memref<128x12xf32, #tpu.memory_space<vmem>>, %arg2: memref<128x4xf32, #tpu.memory_space<vmem>>, %arg3: memref<12x32xf32, #tpu.memory_space<vmem>>, %arg4: memref<4x32xf32, #tpu.memory_space<vmem>>, %arg5: memref<1x32xf32, #tpu.memory_space<vmem>>, %arg6: memref<32x32xf32, #tpu.memory_space<vmem>>, %arg7: memref<1x32xf32, #tpu.memory_space<vmem>>, %arg8: memref<1x32xf32, #tpu.memory_space<vmem>>, %arg9: memref<1x1xf32, #tpu.memory_space<smem>>, %arg10: memref<1x128xf32, #tpu.memory_space<vmem>>) attributes {dimension_semantics = [#tpu.dimension_semantics<parallel>], iteration_bounds = array<i64: 1>, scalar_prefetch = 0 : i64, scratch_operands = 0 : i64, tpu.core_type = #tpu.core_type<tc>, window_params = [{transform_indices = @transform_0, window_bounds = array<i64: 128, 12>}, {transform_indices = @transform_1, window_bounds = array<i64: 128, 4>}, {pipeline_mode = #tpu.pipeline_mode<synchronous>, transform_indices = @transform_2, window_bounds = array<i64: 12, 32>}, {pipeline_mode = #tpu.pipeline_mode<synchronous>, transform_indices = @transform_3, window_bounds = array<i64: 4, 32>}, {pipeline_mode = #tpu.pipeline_mode<synchronous>, transform_indices = @transform_4, window_bounds = array<i64: 1, 32>}, {pipeline_mode = #tpu.pipeline_mode<synchronous>, transform_indices = @transform_5, window_bounds = array<i64: 32, 32>}, {pipeline_mode = #tpu.pipeline_mode<synchronous>, transform_indices = @transform_6, window_bounds = array<i64: 1, 32>}, {pipeline_mode = #tpu.pipeline_mode<synchronous>, transform_indices = @transform_7, window_bounds = array<i64: 1, 32>}, {transform_indices = @transform_8, window_bounds = array<i64: 1, 1>}, {transform_indices = @transform_9, window_bounds = array<i64: 1, 128>}]} {
    %c0 = arith.constant 0 : index
    %c0_0 = arith.constant 0 : index
    %0 = vector.load %arg1[%c0, %c0_0] : memref<128x12xf32, #tpu.memory_space<vmem>>, vector<128x12xf32>
    %c0_1 = arith.constant 0 : index
    %c0_2 = arith.constant 0 : index
    %1 = vector.load %arg3[%c0_1, %c0_2] : memref<12x32xf32, #tpu.memory_space<vmem>>, vector<12x32xf32>
    %cst = arith.constant dense<0.000000e+00> : vector<128x32xf32>
    %2 = tpu.matmul %0, %1, %cst {dimension_numbers = #tpu.dot_dimension_numbers<[1], [0], [0], [1], [0, 0, 1, 1], [], []>} : vector<128x12xf32>, vector<12x32xf32>, vector<128x32xf32> -> vector<128x32xf32>
    %c0_3 = arith.constant 0 : index
    %c0_4 = arith.constant 0 : index
    %3 = vector.load %arg2[%c0_3, %c0_4] : memref<128x4xf32, #tpu.memory_space<vmem>>, vector<128x4xf32>
    %c0_5 = arith.constant 0 : index
    %c0_6 = arith.constant 0 : index
    %4 = vector.load %arg4[%c0_5, %c0_6] : memref<4x32xf32, #tpu.memory_space<vmem>>, vector<4x32xf32>
    %cst_7 = arith.constant dense<0.000000e+00> : vector<128x32xf32>
    %5 = tpu.matmul %3, %4, %cst_7 {dimension_numbers = #tpu.dot_dimension_numbers<[1], [0], [0], [1], [0, 0, 1, 1], [], []>} : vector<128x4xf32>, vector<4x32xf32>, vector<128x32xf32> -> vector<128x32xf32>
    %6 = arith.addf %2, %5 : vector<128x32xf32>
    %c0_8 = arith.constant 0 : index
    %c0_9 = arith.constant 0 : index
    %7 = vector.load %arg5[%c0_8, %c0_9] : memref<1x32xf32, #tpu.memory_space<vmem>>, vector<1x32xf32>
    %8 = vector.broadcast %7 : vector<1x32xf32> to vector<128x32xf32>
    %9 = arith.addf %6, %8 : vector<128x32xf32>
    %cst_10 = arith.constant 0.000000e+00 : f32
    %10 = vector.broadcast %cst_10 : f32 to vector<128x32xf32>
    %11 = arith.maximumf %9, %10 : vector<128x32xf32>
    %c0_11 = arith.constant 0 : index
    %c0_12 = arith.constant 0 : index
    %12 = vector.load %arg6[%c0_11, %c0_12] : memref<32x32xf32, #tpu.memory_space<vmem>>, vector<32x32xf32>
    %cst_13 = arith.constant dense<0.000000e+00> : vector<128x32xf32>
    %13 = tpu.matmul %11, %12, %cst_13 {dimension_numbers = #tpu.dot_dimension_numbers<[1], [0], [0], [1], [0, 0, 1, 1], [], []>} : vector<128x32xf32>, vector<32x32xf32>, vector<128x32xf32> -> vector<128x32xf32>
    %c0_14 = arith.constant 0 : index
    %c0_15 = arith.constant 0 : index
    %14 = vector.load %arg7[%c0_14, %c0_15] : memref<1x32xf32, #tpu.memory_space<vmem>>, vector<1x32xf32>
    %15 = vector.broadcast %14 : vector<1x32xf32> to vector<128x32xf32>
    %16 = arith.addf %13, %15 : vector<128x32xf32>
    %cst_16 = arith.constant 0.000000e+00 : f32
    %17 = vector.broadcast %cst_16 : f32 to vector<128x32xf32>
    %18 = arith.maximumf %16, %17 : vector<128x32xf32>
    %c0_17 = arith.constant 0 : index
    %c0_18 = arith.constant 0 : index
    %19 = vector.load %arg8[%c0_17, %c0_18] : memref<1x32xf32, #tpu.memory_space<vmem>>, vector<1x32xf32>
    %cst_19 = arith.constant dense<0.000000e+00> : vector<1x128xf32>
    %20 = tpu.matmul %19, %18, %cst_19 {dimension_numbers = #tpu.dot_dimension_numbers<[1], [1], [0], [0], [0, 0, 1, 0], [], []>} : vector<1x32xf32>, vector<128x32xf32>, vector<1x128xf32> -> vector<1x128xf32>
    %c0_20 = arith.constant 0 : index
    %c0_21 = arith.constant 0 : index
    %21 = memref.load %arg9[%c0_20, %c0_21] : memref<1x1xf32, #tpu.memory_space<smem>>
    %22 = vector.broadcast %21 : f32 to vector<1x128xf32>
    %23 = arith.addf %20, %22 : vector<1x128xf32>
    %c0_22 = arith.constant 0 : index
    %c0_23 = arith.constant 0 : index
    %24 = vector.load %arg10[%c0_22, %c0_23] : memref<1x128xf32, #tpu.memory_space<vmem>>, vector<1x128xf32>
    tpu.vector_store %arg10[%c0_22, %c0_23], %23 {strides = array<i32>} : memref<1x128xf32, #tpu.memory_space<vmem>>, vector<1x128xf32>,
    return
  }
  func.func @transform_0(%arg0: i32) -> (i32, i32) {
    %c0_i32 = arith.constant 0 : i32
    %c0_i32_0 = arith.constant 0 : i32
    return %arg0, %c0_i32 : i32, i32
  }
  func.func @transform_1(%arg0: i32) -> (i32, i32) {
    %c0_i32 = arith.constant 0 : i32
    %c0_i32_0 = arith.constant 0 : i32
    return %arg0, %c0_i32 : i32, i32
  }
  func.func @transform_2(%arg0: i32) -> (i32, i32) {
    %c0_i32 = arith.constant 0 : i32
    %c0_i32_0 = arith.constant 0 : i32
    %c0_i32_1 = arith.constant 0 : i32
    return %c0_i32, %c0_i32_0 : i32, i32
  }
  func.func @transform_3(%arg0: i32) -> (i32, i32) {
    %c0_i32 = arith.constant 0 : i32
    %c0_i32_0 = arith.constant 0 : i32
    %c0_i32_1 = arith.constant 0 : i32
    return %c0_i32, %c0_i32_0 : i32, i32
  }
  func.func @transform_4(%arg0: i32) -> (i32, i32) {
    %c0_i32 = arith.constant 0 : i32
    %c0_i32_0 = arith.constant 0 : i32
    %c0_i32_1 = arith.constant 0 : i32
    return %c0_i32, %c0_i32_0 : i32, i32
  }
  func.func @transform_5(%arg0: i32) -> (i32, i32) {
    %c0_i32 = arith.constant 0 : i32
    %c0_i32_0 = arith.constant 0 : i32
    %c0_i32_1 = arith.constant 0 : i32
    return %c0_i32, %c0_i32_0 : i32, i32
  }
  func.func @transform_6(%arg0: i32) -> (i32, i32) {
    %c0_i32 = arith.constant 0 : i32
    %c0_i32_0 = arith.constant 0 : i32
    %c0_i32_1 = arith.constant 0 : i32
    return %c0_i32, %c0_i32_0 : i32, i32
  }
  func.func @transform_7(%arg0: i32) -> (i32, i32) {
    %c0_i32 = arith.constant 0 : i32
    %c0_i32_0 = arith.constant 0 : i32
    %c0_i32_1 = arith.constant 0 : i32
    return %c0_i32, %c0_i32_0 : i32, i32
  }
  func.func @transform_8(%arg0: i32) -> (i32, i32) {
    %c0_i32 = arith.constant 0 : i32
    %c0_i32_0 = arith.constant 0 : i32
    %c0_i32_1 = arith.constant 0 : i32
    return %c0_i32, %c0_i32_0 : i32, i32
  }
  func.func @transform_9(%arg0: i32) -> (i32, i32) {
    %c0_i32 = arith.constant 0 : i32
    %c0_i32_0 = arith.constant 0 : i32
    return %c0_i32, %arg0 : i32, i32
  }
}

</mosaic_0001>

<bundles_post_ra>
// kernel: tpu_custom_call.1
= control target key start
LH: loop header
LB: loop body
LE: loop exit
PB: predicated region body
PF: predicated region fallthrough
CT: control target
= control target key end

     0   :  { %vm118_vm0 = vcmask 1043456   ;;  %vm69_vm1 = vcmask 31744   ;;  %vm1216_vm2 = vmmov 1   ;;  %s1491_s0 = inlined_call_operand.vmem [shape: f32[128,12], index: 0, kind: input, shape index: {}]   ;;  %s1492_s1 = inlined_call_operand.vmem [shape: f32[128,4], index: 1, kind: input, shape index: {}]   ;;  %s1493_s2 = inlined_call_operand.vmem [shape: f32[12,32], index: 2, kind: input, shape index: {}]   ;;  %s1494_s3 = inlined_call_operand.vmem [shape: f32[4,32], index: 3, kind: input, shape index: {}]   ;;  %s1495_s4 = inlined_call_operand.vmem [shape: f32[1,32], index: 4, kind: input, shape index: {}]   ;;  %s1496_s5 = inlined_call_operand.vmem [shape: f32[32,32], index: 5, kind: input, shape index: {}]   ;;  %s1497_s6 = inlined_call_operand.vmem [shape: f32[1,32], index: 6, kind: input, shape index: {}]   ;;  %s1498_s7 = inlined_call_operand.vmem [shape: f32[1,32], index: 7, kind: input, shape index: {}]   ;;  %s1499_s8 = inlined_call_operand.<no memory space> [shape: f32[1,1], index: 8, kind: input, shape index: {}]   ;;  %s1500_s9 = inlined_call_operand.hbm [shape: f32[1,128], index: 9, kind: output, shape index: {}]  }
   0x1   :  { %v68_v0 = vld [vmem:[%s1494_s3] sm:$0xf]  ;;  %v53_v2 = vld [vmem:[%s1492_s1 + $0x8] sm:$0xff]  ;;  %v54_v5 = vld [vmem:[%s1492_s1 + $0x10] sm:$0xff] }
   0x2   :  { %v52_v1 = vld [vmem:[%s1492_s1] sm:$0xff]  ;;  %1004 = vmatprep.subr.msk.mxu0 %vm118_vm0, %v68_v0  ;;  %v51_v4 = vld [vmem:[%s1493_s2 + $0x8] sm:$0xf]  ;;  %vm1126_vm3 = vmpackc.low %vm118_vm0, %vm1216_vm2 }
   0x3   :  { %1006 = vmatprep.mubr.msk.f32.mxu0 %vm69_vm1, %v52_v1  ;;  %v50_v3 = vld [vmem:[%s1493_s2] sm:$0xff]  ;;  %1005 = vmatpush3.msk.msra.mxu0 %vm118_vm0, %v68_v0  ;;  %v55_v7 = vld [vmem:[%s1492_s1 + $0x18] sm:$0xff]  ;;  %v57_v9 = vld [vmem:[%s1492_s1 + $0x28] sm:$0xff] }
   0x4   :  { %v1125_v6 = vpack.c.bf16 %v51_v4, %v50_v3  ;;  %1007 = vmatmul.mubr.msk.f32.vlgmr.msra.gmra.mrb[0].mxu0 %vm69_vm1, %v53_v2  ;;  %v56_v8 = vld [vmem:[%s1492_s1 + $0x20] sm:$0xff]  ;;  %v58_v10 = vld [vmem:[%s1492_s1 + $0x30] sm:$0xff]  ;;  %v59_v11 = vld [vmem:[%s1492_s1 + $0x38] sm:$0xff] }
   0x5   :  { %1009 = vmatprep.mubr.msk.f32.mxu0 %vm69_vm1, %v54_v5  ;;  %v503_v12 = vld [vmem:[%s1496_s5] sm:$0xff]  ;;  %v504_v13 = vld [vmem:[%s1496_s5 + $0x8] sm:$0xff] }
   0x6   :  { %1127 = vmatprep.subr.msk.bf16.mxu0 %vm1126_vm3, %v1125_v6 }
   0x7   :  { %1130 = vmatpush3.bf16.msk.msra.mxu0 %vm1126_vm3, %v1125_v6 }
   0x8   :  { %1010 = vmatmul.mubr.msk.f32.gmra.mrb[2].mxu0 %vm69_vm1, %v55_v7 }
   0x9   :  { %1012 = vmatprep.mubr.msk.f32.mxu0 %vm69_vm1, %v56_v8 }
   0xc   :  { %1013 = vmatmul.mubr.msk.f32.gmra.mrb[4].mxu0 %vm69_vm1, %v57_v9 }
   0xd   :  { %1015 = vmatprep.mubr.msk.f32.mxu0 %vm69_vm1, %v58_v10 }
   0xe   :  { %15 = vsyncpa [#allocation4], 0  ;;  %v60_v14 = vld [vmem:[%s1492_s1 + $0x40] sm:$0xff]  ;;  %v1131_v15 = vpack.c.bf16 %v504_v13, %v503_v12  ;;  %v61_v16 = vld [vmem:[%s1492_s1 + $0x48] sm:$0xff]  ;;  %vm267_vm4 = vcmask 97280   ;;  %vm514_vm5 = vcmask 261120  }
   0xf   :  { %v62_v17 = vld [vmem:[%s1492_s1 + $0x50] sm:$0xff]  ;;  %v63_v18 = vld [vmem:[%s1492_s1 + $0x58] sm:$0xff]  ;;  %v64_v19 = vld [vmem:[%s1492_s1 + $0x60] sm:$0xff]  ;;  %vm1218_vm6 = vmmov 0   ;;  %s1220_s19 = smov [#allocation3]  }
  0x10   :  { %1016 = vmatmul.mubr.msk.f32.gmra.mrb[6].mxu0 %vm69_vm1, %v59_v11  ;;  %1132 = vmatprep.subr.bf16.mxu1 %v1131_v15  ;;  %v65_v20 = vld [vmem:[%s1492_s1 + $0x68] sm:$0xff]  ;;  %v66_v21 = vld [vmem:[%s1492_s1 + $0x70] sm:$0xff]  ;;  %v67_v22 = vld [vmem:[%s1492_s1 + $0x78] sm:$0xff]  ;;  %s855_s20 = sshll.u32 %s1220_s19, 4  ;;  %s856_s20 = int_to_ptr.vmem [resolvable:$true] %s855_s20 }
  0x11   :  { %1018 = vmatprep.mubr.msk.f32.mxu0 %vm69_vm1, %v60_v14  ;;  %1134 = vmatpush3.bf16.msra.mxu1 %v1131_v15  ;;  %v34_v23 = vld [vmem:[%s1491_s0] sm:$0xff]  ;;  %v35_v24 = vld [vmem:[%s1491_s0 + $0x8] sm:$0xff]  ;;  %v36_v25 = vld [vmem:[%s1491_s0 + $0x10] sm:$0xff]  ;;  %s1192_s21 = scalar_lea.vmem %s856_s20, 16  ;;  %s1196_s22 = scalar_lea.vmem %s856_s20, 32 }
  0x12   :  { %v37_v26 = vld [vmem:[%s1491_s0 + $0x18] sm:$0xff]  ;;  %v38_v27 = vld [vmem:[%s1491_s0 + $0x20] sm:$0xff]  ;;  %v39_v28 = vld [vmem:[%s1491_s0 + $0x28] sm:$0xff]  ;;  %p1193_p0 = scmp.ne.s32.totalorder %s856_s20, %s1192_s21  ;;  %p1197_p1 = scmp.lt.s32.totalorder %s856_s20, %s856_s20 }
  0x13   :  { %v40_v29 = vld [vmem:[%s1491_s0 + $0x30] sm:$0xff]  ;;  %v41_v30 = vld [vmem:[%s1491_s0 + $0x38] sm:$0xff]  ;;  %v42_v31 = vld [vmem:[%s1491_s0 + $0x40] sm:$0xff]  ;;  %p1198_p2 = scmp.lt.s32.totalorder %s1196_s22, %s1192_s21 }
  0x14   :  { %1019 = vmatmul.mubr.msk.f32.gmra.mrb[8].mxu0 %vm69_vm1, %v61_v16  ;;  %v43_v32 = vld [vmem:[%s1491_s0 + $0x48] sm:$0xff]  ;;  %v44_v33 = vld [vmem:[%s1491_s0 + $0x50] sm:$0xff]  ;;  %v45_v34 = vld [vmem:[%s1491_s0 + $0x58] sm:$0xff] }
  0x15   :  { %1021 = vmatprep.mubr.msk.f32.mxu0 %vm69_vm1, %v62_v17  ;;  %v46_v35 = vld [vmem:[%s1491_s0 + $0x60] sm:$0xff]  ;;  %v47_v36 = vld [vmem:[%s1491_s0 + $0x68] sm:$0xff]  ;;  %v48_v37 = vld [vmem:[%s1491_s0 + $0x70] sm:$0xff]  ;;  %p1199_p3 = por %p1198_p2, %p1197_p1 }
  0x16   :  { %v49_v38 = vld [vmem:[%s1491_s0 + $0x78] sm:$0xff]  ;;  %v505_v39 = vld [vmem:[%s1496_s5 + $0x10] sm:$0xff]  ;;  %v897_v42 = vld [vmem:[%s1495_s4] ss:$0 sm:$0xff] }
  0x17   :  { %v506_v40 = vld [vmem:[%s1496_s5 + $0x18] sm:$0xff]  ;;  %vm1445_vm7 = vmpackc.low %vm514_vm5, %vm514_vm5  ;;  %p1200_p4 = pnand %p1199_p3, %p1193_p0 }
  0x18   :  { %1022 = vmatmul.mubr.msk.f32.gmra.mrb[10].mxu0 %vm69_vm1, %v63_v18  ;;  %v1135_v41 = vpack.c.bf16 %v506_v40, %v505_v39 }
  0x19   :  { %1024 = vmatprep.mubr.msk.f32.mxu0 %vm69_vm1, %v64_v19 }
  0x1a   :  { %1136 = vmatprep.subr.bf16.mxu1 %v1135_v41 }
  0x1b   :  { %1138 = vmatpush3.bf16.msra.mxu1 %v1135_v41 }
  0x1c   :  { %1025 = vmatmul.mubr.msk.f32.gmra.mrb[12].mxu0 %vm69_vm1, %v65_v20 }
  0x1d   :  { %1027 = vmatprep.mubr.msk.f32.mxu0 %vm69_vm1, %v66_v21 }
  0x20   :  { %1028 = vmatmul.mubr.msk.f32.gmra.mrb[14].mxu0 %vm69_vm1, %v67_v22 }
  0x21   :  { %1034 = vmatprep.mubr.msk.f32.mxu0 %vm267_vm4, %v34_v23 }
  0x24   :  { %1035 = vmatmul.mubr.msk.f32.vlgmr.msra.gmra.mrb[0].mxu0 %vm267_vm4, %v35_v24 }
  0x25   :  { %1037 = vmatprep.mubr.msk.f32.mxu0 %vm267_vm4, %v36_v25 }
  0x28   :  { %1038 = vmatmul.mubr.msk.f32.gmra.mrb[2].mxu0 %vm267_vm4, %v37_v26 }
  0x29   :  { %1040 = vmatprep.mubr.msk.f32.mxu0 %vm267_vm4, %v38_v27  ;;  %v1217_v27 = vmov 0.0|0.0  }
  0x2a   :  { %1139 = vmatprep.subr.bf16.mxu1 %v1217_v27 }
  0x2c   :  { %1041 = vmatmul.mubr.msk.f32.gmra.mrb[4].mxu0 %vm267_vm4, %v39_v28  ;;  %v1219_v28 = vmov 0.0  }
  0x2d   :  { %1043 = vmatprep.mubr.msk.f32.mxu0 %vm267_vm4, %v40_v29  ;;  %v898_v29 = vld [vmem:[%s1497_s6] ss:$0 sm:$0xff] }
  0x30   :  { %1044 = vmatmul.mubr.msk.f32.gmra.mrb[6].mxu0 %vm267_vm4, %v41_v30 }
  0x31   :  { %1046 = vmatprep.mubr.msk.f32.mxu0 %vm267_vm4, %v42_v31 }
  0x34   :  { %1047 = vmatmul.mubr.msk.f32.gmra.mrb[8].mxu0 %vm267_vm4, %v43_v32 }
  0x35   :  { %1049 = vmatprep.mubr.msk.f32.mxu0 %vm267_vm4, %v44_v33 }
  0x38   :  { %1050 = vmatmul.mubr.msk.f32.gmra.mrb[10].mxu0 %vm267_vm4, %v45_v34 }
  0x39   :  { %1052 = vmatprep.mubr.msk.f32.mxu0 %vm267_vm4, %v46_v35 }
  0x3c   :  { %1053 = vmatmul.mubr.msk.f32.gmra.mrb[12].mxu0 %vm267_vm4, %v47_v36 }
  0x3d   :  { %1055 = vmatprep.mubr.msk.f32.mxu0 %vm267_vm4, %v48_v37 }
  0x40   :  { %1056 = vmatmul.mubr.msk.f32.gmra.mrb[14].mxu0 %vm267_vm4, %v49_v38 }
  0xf7   :  { %v1036_v43 = vpop.f32.mrb[0].mxu0 }
  0xf8   :  { %v472_v44 = vadd.f32 %v1036_v43, %v897_v42  ;;  %v385_v45 = vpop.f32.mrb[1].mxu0 }
  0xf9   :  { %v471_v46 = vadd.f32 %v897_v42, %v385_v45 }
  0xfa   :  { %v488_v49 = vmax.f32 %v472_v44, 0.0 }
  0xfb   :  { %v487_v47 = vmax.f32 %v471_v46, 0.0  ;;  %v1039_v48 = vpop.f32.mrb[2].mxu0 }
  0xfc   :  { %v474_v50 = vadd.f32 %v1039_v48, %v897_v42  ;;  %v395_v51 = vpop.f32.mrb[3].mxu0 }
  0xfd   :  { %v473_v52 = vadd.f32 %v897_v42, %v395_v51  ;;  %1066 = vmatprep.mubr.msk.f32.mxu1 %vm514_vm5, %v487_v47 }
  0xfe   :  { %1067 = vmatmul.mubr.msk.f32.vlgmr.msra.gmra.mrb[0].mxu1 %vm514_vm5, %v488_v49  ;;  %v490_v55 = vmax.f32 %v474_v50, 0.0 }
  0xff   :  { %v489_v53 = vmax.f32 %v473_v52, 0.0  ;;  %v1042_v54 = vpop.f32.mrb[4].mxu0 }
 0x100   :  { %v476_v56 = vadd.f32 %v1042_v54, %v897_v42  ;;  %v405_v57 = vpop.f32.mrb[5].mxu0 }
 0x101   :  { %v475_v58 = vadd.f32 %v897_v42, %v405_v57  ;;  %1069 = vmatprep.mubr.msk.f32.mxu1 %vm514_vm5, %v489_v53 }
 0x102   :  { %1070 = vmatmul.mubr.msk.f32.gmra.mrb[2].mxu1 %vm514_vm5, %v490_v55  ;;  %v492_v61 = vmax.f32 %v476_v56, 0.0 }
 0x103   :  { %v491_v59 = vmax.f32 %v475_v58, 0.0  ;;  %v1045_v60 = vpop.f32.mrb[6].mxu0 }
 0x104   :  { %v478_v62 = vadd.f32 %v1045_v60, %v897_v42  ;;  %v415_v63 = vpop.f32.mrb[7].mxu0 }
 0x105   :  { %v477_v0 = vadd.f32 %v897_v42, %v415_v63  ;;  %1072 = vmatprep.mubr.msk.f32.mxu1 %vm514_vm5, %v491_v59 }
 0x106   :  { %1073 = vmatmul.mubr.msk.f32.gmra.mrb[4].mxu1 %vm514_vm5, %v492_v61  ;;  %v494_v3 = vmax.f32 %v478_v62, 0.0 }
 0x107   :  { %v493_v1 = vmax.f32 %v477_v0, 0.0  ;;  %v1048_v2 = vpop.f32.mrb[8].mxu0 }
 0x108   :  { %v480_v4 = vadd.f32 %v1048_v2, %v897_v42  ;;  %v425_v5 = vpop.f32.mrb[9].mxu0 }
 0x109   :  { %v479_v6 = vadd.f32 %v897_v42, %v425_v5  ;;  %1075 = vmatprep.mubr.msk.f32.mxu1 %vm514_vm5, %v493_v1 }
 0x10a   :  { %1076 = vmatmul.mubr.msk.f32.gmra.mrb[6].mxu1 %vm514_vm5, %v494_v3  ;;  %v496_v9 = vmax.f32 %v480_v4, 0.0 }
 0x10b   :  { %v495_v7 = vmax.f32 %v479_v6, 0.0  ;;  %v1051_v8 = vpop.f32.mrb[10].mxu0 }
 0x10c   :  { %v482_v10 = vadd.f32 %v1051_v8, %v897_v42  ;;  %v435_v11 = vpop.f32.mrb[11].mxu0 }
 0x10d   :  { %v481_v12 = vadd.f32 %v897_v42, %v435_v11  ;;  %1078 = vmatprep.mubr.msk.f32.mxu1 %vm514_vm5, %v495_v7 }
 0x10e   :  { %1079 = vmatmul.mubr.msk.f32.gmra.mrb[8].mxu1 %vm514_vm5, %v496_v9  ;;  %v498_v15 = vmax.f32 %v482_v10, 0.0 }
 0x10f   :  { %v497_v13 = vmax.f32 %v481_v12, 0.0  ;;  %v1054_v14 = vpop.f32.mrb[12].mxu0 }
 0x110   :  { %v484_v16 = vadd.f32 %v1054_v14, %v897_v42  ;;  %v445_v17 = vpop.f32.mrb[13].mxu0 }
 0x111   :  { %v483_v18 = vadd.f32 %v897_v42, %v445_v17  ;;  %1081 = vmatprep.mubr.msk.f32.mxu1 %vm514_vm5, %v497_v13 }
 0x112   :  { %1082 = vmatmul.mubr.msk.f32.gmra.mrb[10].mxu1 %vm514_vm5, %v498_v15  ;;  %v500_v21 = vmax.f32 %v484_v16, 0.0 }
 0x113   :  { %v499_v19 = vmax.f32 %v483_v18, 0.0  ;;  %v1057_v20 = vpop.f32.mrb[14].mxu0 }
 0x114   :  { %v486_v22 = vadd.f32 %v1057_v20, %v897_v42  ;;  %v455_v23 = vpop.f32.mrb[15].mxu0 }
 0x115   :  { %v485_v24 = vadd.f32 %v897_v42, %v455_v23  ;;  %1084 = vmatprep.mubr.msk.f32.mxu1 %vm514_vm5, %v499_v19  ;;  %v724_v23 = vld [vmem:[%s1498_s7] sm:$0x1] }
 0x116   :  { %1085 = vmatmul.mubr.msk.f32.gmra.mrb[12].mxu1 %vm514_vm5, %v500_v21  ;;  %v502_v26 = vmax.f32 %v486_v22, 0.0 }
 0x117   :  { %v501_v25 = vmax.f32 %v485_v24, 0.0  ;;  %v726_v24 = vstv %s1499_s8 }
 0x119   :  { %1087 = vmatprep.mubr.msk.f32.mxu1 %vm514_vm5, %v501_v25 }
 0x11a   :  { %1088 = vmatmul.mubr.msk.f32.gmra.mrb[14].mxu1 %vm514_vm5, %v502_v26 }
 0x11b   :  { %1122 = vmatprep.mubr.msk.f32.mxu1 %vm1218_vm6, %v1219_v28 }
 0x1d1   :  { %v1068_v30 = vpop.f32.mrb[0].mxu1 }
 0x1d2   :  { %v635_v31 = vadd.f32 %v1068_v30, %v898_v29  ;;  %v629_v32 = vpop.f32.mrb[1].mxu1 }
 0x1d3   :  { %v630_v33 = vadd.f32 %v898_v29, %v629_v32 }
 0x1d4   :  { %v709_v34 = vmax.f32 %v635_v31, 0.0 }
 0x1d5   :  { %v708_v35 = vmax.f32 %v630_v33, 0.0  ;;  %v1071_v36 = vpop.f32.mrb[2].mxu1 }
 0x1d6   :  { %v645_v37 = vadd.f32 %v1071_v36, %v898_v29  ;;  %v639_v38 = vpop.f32.mrb[3].mxu1 }
 0x1d7   :  { %v1140_v40 = vpack.c.bf16 %v709_v34, %v708_v35  ;;  %v640_v41 = vadd.f32 %v898_v29, %v639_v38 }
 0x1d8   :  { %v711_v42 = vmax.f32 %v645_v37, 0.0 }
 0x1d9   :  { %v710_v43 = vmax.f32 %v640_v41, 0.0  ;;  %v1074_v44 = vpop.f32.mrb[4].mxu1  ;;  %1142 = vmatpush3.bf16.xpose.msk.msra.mxu1 %vm1445_vm7, %v1140_v40 }
 0x1da   :  { %v655_v45 = vadd.f32 %v1074_v44, %v898_v29  ;;  %v649_v46 = vpop.f32.mrb[5].mxu1  ;;  %1143 = vmatprep.subr.bf16.mxu1 %v1217_v27 }
 0x1db   :  { %v1144_v47 = vpack.c.bf16 %v711_v42, %v710_v43  ;;  %v650_v48 = vadd.f32 %v898_v29, %v649_v46 }
 0x1dc   :  { %v713_v49 = vmax.f32 %v655_v45, 0.0 }
 0x1dd   :  { %v712_v50 = vmax.f32 %v650_v48, 0.0  ;;  %v1077_v51 = vpop.f32.mrb[6].mxu1 }
 0x1de   :  { %v665_v52 = vadd.f32 %v1077_v51, %v898_v29  ;;  %v659_v53 = vpop.f32.mrb[7].mxu1 }
 0x1df   :  { %v1148_v54 = vpack.c.bf16 %v713_v49, %v712_v50  ;;  %v660_v55 = vadd.f32 %v898_v29, %v659_v53 }
 0x1e0   :  { %v715_v56 = vmax.f32 %v665_v52, 0.0 }
 0x1e1   :  { %v714_v57 = vmax.f32 %v660_v55, 0.0  ;;  %v1080_v58 = vpop.f32.mrb[8].mxu1  ;;  %1146 = vmatpush3.bf16.xpose.msk.msra.mxu1 %vm1445_vm7, %v1144_v47 }
 0x1e2   :  { %v675_v59 = vadd.f32 %v1080_v58, %v898_v29  ;;  %v669_v60 = vpop.f32.mrb[9].mxu1  ;;  %1147 = vmatprep.subr.bf16.mxu1 %v1217_v27 }
 0x1e3   :  { %v1152_v61 = vpack.c.bf16 %v715_v56, %v714_v57  ;;  %v670_v62 = vadd.f32 %v898_v29, %v669_v60 }
 0x1e4   :  { %v717_v63 = vmax.f32 %v675_v59, 0.0 }
 0x1e5   :  { %v716_v0 = vmax.f32 %v670_v62, 0.0  ;;  %v1083_v1 = vpop.f32.mrb[10].mxu1 }
 0x1e6   :  { %v685_v2 = vadd.f32 %v1083_v1, %v898_v29  ;;  %v679_v3 = vpop.f32.mrb[11].mxu1 }
 0x1e7   :  { %v1156_v4 = vpack.c.bf16 %v717_v63, %v716_v0  ;;  %v680_v5 = vadd.f32 %v898_v29, %v679_v3 }
 0x1e8   :  { %v719_v6 = vmax.f32 %v685_v2, 0.0 }
 0x1e9   :  { %v718_v7 = vmax.f32 %v680_v5, 0.0  ;;  %v1086_v8 = vpop.f32.mrb[12].mxu1  ;;  %1150 = vmatpush3.bf16.xpose.msk.msra.mxu1 %vm1445_vm7, %v1148_v54 }
 0x1ea   :  { %v695_v9 = vadd.f32 %v1086_v8, %v898_v29  ;;  %v689_v10 = vpop.f32.mrb[13].mxu1  ;;  %1151 = vmatprep.subr.bf16.mxu1 %v1217_v27 }
 0x1eb   :  { %v1160_v11 = vpack.c.bf16 %v719_v6, %v718_v7  ;;  %v690_v12 = vadd.f32 %v898_v29, %v689_v10 }
 0x1ec   :  { %v721_v13 = vmax.f32 %v695_v9, 0.0 }
 0x1ed   :  { %v720_v14 = vmax.f32 %v690_v12, 0.0  ;;  %v1089_v15 = vpop.f32.mrb[14].mxu1 }
 0x1ee   :  { %v705_v16 = vadd.f32 %v1089_v15, %v898_v29  ;;  %v699_v17 = vpop.f32.mrb[15].mxu1 }
 0x1ef   :  { %v1164_v18 = vpack.c.bf16 %v721_v13, %v720_v14  ;;  %v700_v19 = vadd.f32 %v898_v29, %v699_v17 }
 0x1f0   :  { %v723_v20 = vmax.f32 %v705_v16, 0.0 }
 0x1f1   :  { %v722_v21 = vmax.f32 %v700_v19, 0.0  ;;  %1154 = vmatpush3.bf16.xpose.msk.msra.mxu1 %vm1445_vm7, %v1152_v61 }
 0x1f2   :  { %1155 = vmatprep.subr.bf16.mxu1 %v1217_v27 }
 0x1f3   :  { %v1168_v22 = vpack.c.bf16 %v723_v20, %v722_v21 }
 0x1f9   :  { %1158 = vmatpush3.bf16.xpose.msk.msra.mxu1 %vm1445_vm7, %v1156_v4 }
 0x1fa   :  { %1159 = vmatprep.subr.bf16.mxu1 %v1217_v27 }
 0x201   :  { %1162 = vmatpush3.bf16.xpose.msk.msra.mxu1 %vm1445_vm7, %v1160_v11 }
 0x202   :  { %1163 = vmatprep.subr.bf16.mxu1 %v1217_v27 }
 0x209   :  { %1166 = vmatpush3.bf16.xpose.msk.msra.mxu1 %vm1445_vm7, %v1164_v18 }
 0x20a   :  { %1167 = vmatprep.subr.bf16.mxu1 %v1217_v27 }
 0x211   :  { %1170 = vmatpush3.bf16.xpose.msk.msra.mxu1 %vm1445_vm7, %v1168_v22 }
 0x218   :  { %1123 = vmatmul.mubr.msk.f32.vlgmr.msra.gmra.mrb[16].mxu1 %vm514_vm5, %v724_v23 }
 0x2eb   :  { %v844_v25 = vpop.f32.mrb[16].mxu1 }
 0x2ec   :  { %v845_v26 = vadd.f32 %v844_v25, %v726_v24  ;;  %v1124_v28 = vpop.f32.mrb[17].mxu1 }
 0x2ee   :  { %848 = vst [vmem:[#allocation3] sm:$0x1] %v845_v26 }
 0x2ef   :  { %1203 = shalt.err (!%p1200_p4)
}
 0x2f0   :  { %s1204_s23 = scalar_lea.hbm %s1500_s9, 16 }
 0x2f1   :  { %p1205_p5 = scmp.ne.s32.totalorder %s1500_s9, %s1204_s23  ;;  %p1208_p6 = scmp.lt.u32.totalorder %s1204_s23, %s1500_s9 }
 0x2f3   :  { %p1210_p7 = pnand %p1208_p6, %p1205_p5 }
 0x2f5   :  { %1213 = shalt.err (!%p1210_p7)
}
 0x2f6   :  { %858 = dma.vmem_to_hbm [thread:$0]  %s856_s20, 16, %s1500_s9, [#allocation4]  }
 0x2f7   :  { %1214 = dma.done.wait [#allocation4], 16  }
 0x2f8   :  { %1215 = vsyncadd [#allocation4], 4294967280 }
 0x2f9   :  { %862 = vsyncpa [#allocation4], 1 }

</bundles_post_ra>
